<compile_context>
chip_gen: v7x
topology: tpu7x:2x2x1
jax: 0.10.0
libtpu: 0.0.40
codegen_flags: <defaults>
</compile_context>

<pallas_src>
import jax
import jax.numpy as jnp
from jax.experimental import pallas as pl
from jax.experimental.pallas import tpu as pltpu


def _sobel_kernel(x_ref, o_ref):
    # x_ref: (TB, 1, H, W) input image block in VMEM
    # o_ref: (TB, 2, H, W) output block (channel 0 = Kx response, channel 1 = Ky)
    tb = x_ref.shape[0]
    h = x_ref.shape[2]
    w = x_ref.shape[3]

    # Boundary masks (built once per grid step, shared by all images in the block).
    col = jax.lax.broadcasted_iota(jnp.int32, (h, w), 1)
    row = jax.lax.broadcasted_iota(jnp.int32, (h, w), 0)
    first_col = col == 0
    last_col = col == (w - 1)
    first_row = row == 0
    last_row = row == (h - 1)

    for b in range(tb):  # tb is a static block dim (small) -> fully unrolled
        x = x_ref[b, 0].astype(jnp.float32)

        # Horizontal neighbours via XLU lane rotation; the wrapped boundary column is
        # zeroed to emulate the conv's zero padding (padding=1).
        left = jnp.where(first_col, 0.0, pltpu.roll(x, 1 % w, axis=1))        # x[r, c-1]
        right = jnp.where(last_col, 0.0, pltpu.roll(x, (w - 1) % w, axis=1))  # x[r, c+1]

        hx = left - right               # horizontal difference (Kx row = [1, 0, -1])
        hs = left + 2.0 * x + right     # horizontal smoothing  (Ky row = [1, 2, 1])

        # Vertical neighbours via XLU sublane rotation + zero-pad masking.
        up_hx = jnp.where(first_row, 0.0, pltpu.roll(hx, 1 % h, axis=0))
        dn_hx = jnp.where(last_row, 0.0, pltpu.roll(hx, (h - 1) % h, axis=0))
        up_hs = jnp.where(first_row, 0.0, pltpu.roll(hs, 1 % h, axis=0))
        dn_hs = jnp.where(last_row, 0.0, pltpu.roll(hs, (h - 1) % h, axis=0))

        gx = up_hx + 2.0 * hx + dn_hx   # Kx = [[1,0,-1],[2,0,-2],[1,0,-1]]
        gy = up_hs - dn_hs              # Ky = [[1,2,1],[0,0,0],[-1,-2,-1]]

        o_ref[b, 0] = gx.astype(o_ref.dtype)
        o_ref[b, 1] = gy.astype(o_ref.dtype)


def _pick_batch_tile(n: int, h: int, w: int) -> int:
    """Images per grid step.

    Budget per step: (1 input + 2 output channels) * 2 pipeline buffers * 4 B plus a
    handful of f32 temporaries per image (~36 B/pixel).  Kept well under the 32 MiB
    default scoped VMEM so the identical tiling also fits v7x (64 MiB physical).
    """
    bytes_per_image = 36 * h * w
    budget = 20 * 1024 * 1024
    tb = max(1, min(budget // max(bytes_per_image, 1), 8))
    if n >= 2:
        # Keep at least two grid steps so both v7x TensorCores get "parallel" work.
        tb = min(tb, max(1, n // 2))
    tb = max(1, min(tb, n))
    while n % tb:
        tb -= 1
    return tb


def sobel(x: jax.Array) -> jax.Array:
    """x: (N, 1, H, W) float32 -> (N, 2, H, W) Sobel gx/gy (zero padding, padding=1)."""
    n, c, h, w = x.shape
    assert c == 1, "Sobel module expects single-channel input (Conv2d(1, 2, ...))"

    tb = _pick_batch_tile(n, h, w)
    # TODO(synk): for very large images (whole-image blocks approaching the VMEM
    # budget) add intra-image row tiling with a carried 1-row halo.
    out = pl.pallas_call(
        _sobel_kernel,
        out_shape=jax.ShapeDtypeStruct((n, 2, h, w), x.dtype),
        grid=(n // tb,),
        in_specs=[pl.BlockSpec((tb, 1, h, w), lambda b: (b, 0, 0, 0))],
        out_specs=pl.BlockSpec((tb, 2, h, w), lambda b: (b, 0, 0, 0)),
        compiler_params=pltpu.CompilerParams(dimension_semantics=("parallel",)),
    )(x)

    # Mirrors PyTorch's `out.contiguous().view(-1, 2, H, W)` (identity here).
    return out.reshape(-1, 2, h, w)


def _sobel_reference(x: jax.Array) -> jax.Array:
    """Pure-JAX reference using lax conv (same as the PyTorch Conv2d)."""
    kx = jnp.array([[1, 0, -1], [2, 0, -2], [1, 0, -1]], dtype=jnp.float32)
    ky = jnp.array([[1, 2, 1], [0, 0, 0], [-1, -2, -1]], dtype=jnp.float32)
    wts = jnp.stack((kx, ky))[:, None, :, :]  # (2, 1, 3, 3) OIHW
    return jax.lax.conv_general_dilated(
        x, wts, window_strides=(1, 1), padding=((1, 1), (1, 1)),
        dimension_numbers=("NCHW", "OIHW", "NCHW"),
        precision=jax.lax.Precision.HIGHEST)


if __name__ == "__main__":
    key = jax.random.PRNGKey(0)
    x = jax.random.normal(key, (2, 1, 16, 16), dtype=jnp.float32)

    out = jax.block_until_ready(sobel(x))
    ref = _sobel_reference(x)

    assert out.shape == (2, 2, 16, 16)
    assert jnp.allclose(out, ref, atol=1e-5, rtol=1e-5)

    print("KERNEL_OK")
</pallas_src>

<mosaic_0001>
module attributes {stable_mosaic.version = 11 : i64} {
  func.func @_sobel_kernel(%arg0: i32, %arg1: memref<1x1x16x16xf32, #tpu.memory_space<vmem>>, %arg2: memref<1x2x16x16xf32, #tpu.memory_space<vmem>>) attributes {dimension_semantics = [#tpu.dimension_semantics<parallel>], iteration_bounds = array<i64: 2>, scalar_prefetch = 0 : i64, scratch_operands = 0 : i64, tpu.core_type = #tpu.core_type<tc>, window_params = [{transform_indices = @transform_0, window_bounds = array<i64: 1, 1, 16, 16>}, {transform_indices = @transform_1, window_bounds = array<i64: 1, 2, 16, 16>}]} {
    %0 = tpu.iota {dimensions = array<i32: 1>} : vector<16x16xi32>
    %1 = tpu.iota {dimensions = array<i32: 0>} : vector<16x16xi32>
    %c0_i32 = arith.constant 0 : i32
    %2 = vector.broadcast %c0_i32 : i32 to vector<16x16xi32>
    %3 = arith.cmpi eq, %0, %2 : vector<16x16xi32>
    %c15_i32 = arith.constant 15 : i32
    %4 = vector.broadcast %c15_i32 : i32 to vector<16x16xi32>
    %5 = arith.cmpi eq, %0, %4 : vector<16x16xi32>
    %c0_i32_0 = arith.constant 0 : i32
    %6 = vector.broadcast %c0_i32_0 : i32 to vector<16x16xi32>
    %7 = arith.cmpi eq, %1, %6 : vector<16x16xi32>
    %c15_i32_1 = arith.constant 15 : i32
    %8 = vector.broadcast %c15_i32_1 : i32 to vector<16x16xi32>
    %9 = arith.cmpi eq, %1, %8 : vector<16x16xi32>
    %c0 = arith.constant 0 : index
    %c0_2 = arith.constant 0 : index
    %c0_3 = arith.constant 0 : index
    %c0_4 = arith.constant 0 : index
    %10 = vector.load %arg1[%c0, %c0_2, %c0_3, %c0_4] : memref<1x1x16x16xf32, #tpu.memory_space<vmem>>, vector<1x1x16x16xf32>
    %11 = vector.shape_cast %10 : vector<1x1x16x16xf32> to vector<16x16xf32>
    %c1_i32 = arith.constant 1 : i32
    %12 = tpu.dynamic_rotate %11 by %c1_i32 dim 1 : vector<16x16xf32>, i32 -> vector<16x16xf32>
    %cst = arith.constant 0.000000e+00 : f32
    %13 = vector.broadcast %cst : f32 to vector<16x16xf32>
    %14 = arith.select %3, %13, %12 : vector<16x16xi1>, vector<16x16xf32>
    %c15_i32_5 = arith.constant 15 : i32
    %15 = tpu.dynamic_rotate %11 by %c15_i32_5 dim 1 : vector<16x16xf32>, i32 -> vector<16x16xf32>
    %cst_6 = arith.constant 0.000000e+00 : f32
    %16 = vector.broadcast %cst_6 : f32 to vector<16x16xf32>
    %17 = arith.select %5, %16, %15 : vector<16x16xi1>, vector<16x16xf32>
    %18 = arith.subf %14, %17 : vector<16x16xf32>
    %cst_7 = arith.constant 2.000000e+00 : f32
    %19 = vector.broadcast %cst_7 : f32 to vector<16x16xf32>
    %20 = arith.mulf %19, %11 : vector<16x16xf32>
    %21 = arith.addf %14, %20 : vector<16x16xf32>
    %22 = arith.addf %21, %17 : vector<16x16xf32>
    %c1_i32_8 = arith.constant 1 : i32
    %23 = tpu.dynamic_rotate %18 by %c1_i32_8 dim 0 : vector<16x16xf32>, i32 -> vector<16x16xf32>
    %cst_9 = arith.constant 0.000000e+00 : f32
    %24 = vector.broadcast %cst_9 : f32 to vector<16x16xf32>
    %25 = arith.select %7, %24, %23 : vector<16x16xi1>, vector<16x16xf32>
    %c15_i32_10 = arith.constant 15 : i32
    %26 = tpu.dynamic_rotate %18 by %c15_i32_10 dim 0 : vector<16x16xf32>, i32 -> vector<16x16xf32>
    %cst_11 = arith.constant 0.000000e+00 : f32
    %27 = vector.broadcast %cst_11 : f32 to vector<16x16xf32>
    %28 = arith.select %9, %27, %26 : vector<16x16xi1>, vector<16x16xf32>
    %c1_i32_12 = arith.constant 1 : i32
    %29 = tpu.dynamic_rotate %22 by %c1_i32_12 dim 0 : vector<16x16xf32>, i32 -> vector<16x16xf32>
    %cst_13 = arith.constant 0.000000e+00 : f32
    %30 = vector.broadcast %cst_13 : f32 to vector<16x16xf32>
    %31 = arith.select %7, %30, %29 : vector<16x16xi1>, vector<16x16xf32>
    %c15_i32_14 = arith.constant 15 : i32
    %32 = tpu.dynamic_rotate %22 by %c15_i32_14 dim 0 : vector<16x16xf32>, i32 -> vector<16x16xf32>
    %cst_15 = arith.constant 0.000000e+00 : f32
    %33 = vector.broadcast %cst_15 : f32 to vector<16x16xf32>
    %34 = arith.select %9, %33, %32 : vector<16x16xi1>, vector<16x16xf32>
    %cst_16 = arith.constant 2.000000e+00 : f32
    %35 = vector.broadcast %cst_16 : f32 to vector<16x16xf32>
    %36 = arith.mulf %35, %18 : vector<16x16xf32>
    %37 = arith.addf %25, %36 : vector<16x16xf32>
    %38 = arith.addf %37, %28 : vector<16x16xf32>
    %39 = arith.subf %31, %34 : vector<16x16xf32>
    %c0_17 = arith.constant 0 : index
    %c0_18 = arith.constant 0 : index
    %c0_19 = arith.constant 0 : index
    %c0_20 = arith.constant 0 : index
    %40 = vector.load %arg2[%c0_17, %c0_18, %c0_19, %c0_20] : memref<1x2x16x16xf32, #tpu.memory_space<vmem>>, vector<1x1x16x16xf32>
    %41 = vector.shape_cast %40 : vector<1x1x16x16xf32> to vector<16x16xf32>
    %42 = vector.shape_cast %38 : vector<16x16xf32> to vector<1x1x16x16xf32>
    tpu.vector_store %arg2[%c0_17, %c0_18, %c0_19, %c0_20], %42 {strides = array<i32>} : memref<1x2x16x16xf32, #tpu.memory_space<vmem>>, vector<1x1x16x16xf32>,
    %c0_21 = arith.constant 0 : index
    %c1 = arith.constant 1 : index
    %c0_22 = arith.constant 0 : index
    %c0_23 = arith.constant 0 : index
    %43 = vector.load %arg2[%c0_21, %c1, %c0_22, %c0_23] : memref<1x2x16x16xf32, #tpu.memory_space<vmem>>, vector<1x1x16x16xf32>
    %44 = vector.shape_cast %43 : vector<1x1x16x16xf32> to vector<16x16xf32>
    %45 = vector.shape_cast %39 : vector<16x16xf32> to vector<1x1x16x16xf32>
    tpu.vector_store %arg2[%c0_21, %c1, %c0_22, %c0_23], %45 {strides = array<i32>} : memref<1x2x16x16xf32, #tpu.memory_space<vmem>>, vector<1x1x16x16xf32>,
    return
  }
  func.func @transform_0(%arg0: i32) -> (i32, i32, i32, i32) {
    %c0_i32 = arith.constant 0 : i32
    %c0_i32_0 = arith.constant 0 : i32
    %c0_i32_1 = arith.constant 0 : i32
    %c0_i32_2 = arith.constant 0 : i32
    return %arg0, %c0_i32, %c0_i32_0, %c0_i32_1 : i32, i32, i32, i32
  }
  func.func @transform_1(%arg0: i32) -> (i32, i32, i32, i32) {
    %c0_i32 = arith.constant 0 : i32
    %c0_i32_0 = arith.constant 0 : i32
    %c0_i32_1 = arith.constant 0 : i32
    %c0_i32_2 = arith.constant 0 : i32
    return %arg0, %c0_i32, %c0_i32_0, %c0_i32_1 : i32, i32, i32, i32
  }
}

</mosaic_0001>

<bundles_post_ra>
// kernel: tpu_custom_call.1
= control target key start
LH: loop header
LB: loop body
LE: loop exit
PB: predicated region body
PF: predicated region fallthrough
CT: control target
= control target key end

     0   :  { %6 = vsyncpa [#allocation3], 0  ;;  %s683_s0 = inlined_call_operand.hbm [shape: f32[2,1,16,16], index: 0, kind: input, shape index: {}]   ;;  %s684_s1 = inlined_call_operand.hbm [shape: f32[2,2,16,16], index: 1, kind: output, shape index: {}]  }
   0x1   :  { %8 = vsyncpa [#allocation3 + $0x1], 0 }
   0x2   :  { %9 = vsyncpa [#allocation4], 0 }
   0x3   :  { %11 = vsyncpa [#allocation4 + $0x1], 0  ;;  %s502_s6 = smov 0   ;;  %s504_s7 = smov 0  }
   0x4   :  { %s506_s8 = smov 0   ;;  %s508_s9 = smov 0  }
   0x5 LB: > { %s523_s10 = sadd.s32 4294967295, %s481_s9   ;;  %s314_s11 = sadd.s32 4294967294, %s481_s9   ;;  %s481_s9 = sphi %s508_s9, %s697_s9   ;;  %s477_s8 = sphi %s506_s8, %s696_s8   ;;  %s473_s7 = sphi %s504_s7, %s695_s7   ;;  %s469_s6 = sphi %s502_s6, %s694_s6  }
   0x6   : > { %s527_s12 = sadd.s32 1, %s481_s9   ;;  %s24_s13 = sadd.s32 1, %s477_s8 }
   0x7   : > { %s21_s14 = ssub.s32 %s481_s9, %s527_s12  ;;  %p31_p0 = scmp.ne.s32.totalorder %s477_s8, %s473_s7 }
   0x8   : > { %p22_p1 = scmp.eq.s32.totalorder %s21_s14, 0  ;;  %p32_p2 = scmp.eq.s32.totalorder %s481_s9, 0 }
   0x9   : > { %p37_p3 = scmp.ne.s32.totalorder %s473_s7, %s469_s6  ;;  %p38_p4 = scmp.eq.s32.totalorder %s523_s10, 0 }
   0xa   : > { %s539_s15 = scalar_select %p22_p1, %s477_s8, %s24_s13  }
   0xb   : > { %p541_p5 = por %p32_p2, %p31_p0  ;;  %p545_p6 = por %p38_p4, %p37_p3 }
   0xc   : > { %p61_p7 = scmp.eq.s32.totalorder %s523_s10, 1  ;;  %p67_p8 = scmp.eq.s32.totalorder %s314_s11, 1 }
   0xd   : > { %p344_p10 = scmp.lt.s32.totalorder %s481_s9, 2  ;;  %s87_s20 = sand.u32 1, %s477_s8  }
   0xe   : > { %p552_p11 = por %p61_p7, %p31_p0  ;;  %p556_p12 = por %p67_p8, %p37_p3 }
   0xf   : > { %s330_s21 = sshll.u32 %s481_s9, 8  ;;  %s317_s22 = sshll.u32 %s87_s20, 4 }
  0x10   : > { %s688_s18 = scalar_select %p552_p11, 1, 0 }
  0x11   : > { %s689_s19 = scalar_select %p556_p12, 1, 0 }
  0x12   : > { %s565_s25 = scalar_lea.hbm %s683_s0, %s330_s21  ;;  %s91_s26 = scalar_lea.vmem [#allocation2], %s317_s22 }
  0x13   : > { %s98_s27 = sshll.u32 %s91_s26, 4  ;;  %p569_p13 = pnand %p344_p10, %p541_p5  ;;  %s573_s27 = int_to_ptr.vmem [resolvable:$true] %s98_s27 }
  0x14   : > { %s575_s29 = scalar_lea.sflag [#allocation3], %s87_s20  ;;  %s385_s30 = scalar_lea.hbm %s565_s25, 256 }
  0x15   : > { %p386_p0 = scmp.ne.s32.totalorder %s565_s25, %s385_s30  ;;  %p387_p1 = pneg %p569_p13 }
  0x16   : > { %s390_s4 = scalar_lea.hbm %s683_s0, 512  ;;  %p391_p4 = scmp.lt.u32.totalorder %s565_s25, %s683_s0 }
  0x17   : > { %p388_p2 = pnand %p387_p1, %p386_p0  ;;  %p392_p5 = scmp.lt.u32.totalorder %s390_s4, %s385_s30 }
  0x18   : > { %p394_p8 = scmp.lt.u32.totalorder %s385_s30, %s565_s25 }
  0x19   : > { %p389_p3 = pneg %p388_p2  ;;  %p393_p7 = por %p392_p5, %p391_p4 }
  0x1b   : > { %p395_p10 = por %p394_p8, %p393_p7 }
  0x1d   : > { %p396_p9 = pnand %p395_p10, %p389_p3 }
  0x1f   : > { %399 = shalt.err (!%p396_p9)
}
  0x20   : > { %s400_s13 = scalar_lea.vmem %s573_s27, 256  ;;  %s483_s14 = smov [#allocation2]  }
  0x21   : > { %p401_p0 = scmp.ne.s32.totalorder %s573_s27, %s400_s13  ;;  %s405_s16 = sshll.u32 %s483_s14, 4  ;;  %s406_s16 = int_to_ptr.vmem [resolvable:$false] %s405_s16 }
  0x22   : > { %s407_s20 = scalar_lea.vmem %s406_s16, 512  ;;  %p408_p11 = scmp.lt.s32.totalorder %s573_s27, %s406_s16 }
  0x23   : > { %p403_p2 = pnand %p401_p0, %p387_p1  ;;  %p409_p4 = scmp.lt.s32.totalorder %s407_s20, %s400_s13 }
  0x25   : > { %p404_p12 = pneg %p403_p2  ;;  %p410_p5 = por %p409_p4, %p408_p11 }
  0x27   : > { %p411_p7 = pnand %p410_p5, %p404_p12 }
  0x29   : > { %414 = shalt.err (!%p411_p7)
}
  0x2a   : > { %s484_s21 = smov 128   ;;  %s485_s22 = smov 8  }
  0x2b   : > { %339 = dma.hbm_to_vmem [thread:$0]  (!%p569_p13), %s565_s25, 256, %s573_s27, %s575_s29, %s484_s21, %s484_s21, %s485_s22  }
  0x2c   : > { %p320_p9 = scmp.ge.s32.totalorder %s481_s9, 1  ;;  %p106_p1 = scmp.lt.s32.totalorder %s481_s9, 3 }
  0x2e   : > { %p107_p3 = pnand %p320_p9, %p106_p1 }
  0x2f   : > { %s606_s23 = sand.u32 (!%p107_p3), 1, %s473_s7  }
  0x30   : > { %110 = sbr.rel (%p107_p3) target bundleno = 439 (0x1b7), region = 24  ;;  %s321_s24 = sshll.u32 (!%p107_p3), %s606_s23, 4 }
  0x31   : > { %s113_s26 = scalar_lea.sflag (!%p107_p3), [#allocation3], %s606_s23  ;;  %s116_s30 = scalar_lea.vmem (!%p107_p3), [#allocation2], %s321_s24 }
  0x37   : > { %460 = dma.done.wait (%p545_p6), %s113_s26, 256  }
  0x38   : > { %462 = vsyncadd (%p545_p6), %s113_s26, 4294967040  ;;  %v146_v0 = vld [vmem:[%s116_s30] sm:$0xff]  ;;  %s486_s25 = smov 16   ;;  %v147_v1 = vld [vmem:[%s116_s30 + $0x8] sm:$0xff]  ;;  %vm148_vm0 = vcmask 1047680   ;;  %s487_s27 = smov 113   ;;  %v135_v10 = vlaneseq }
  0x39   : > { %149 = vrot.lane.b32.xlu0 %v146_v0, %s486_s25  ;;  %s488_s17 = smov 127   ;;  %v181_v14 = vmul.f32 2.0, %v146_v0  ;;  %v182_v16 = vmul.f32 2.0, %v147_v1  ;;  %s322_s28 = sshll.u32 %s606_s23, 5  ;;  %vm221_vm7 = vcmask 130048  }
  0x3a   : > { %v136_v11 = vand.u32 127, %v135_v10  ;;  %v138_v13 = vshrl.u32 %v135_v10, 7  ;;  %s331_s29 = sshll.u32 %s523_s10, 9  ;;  %s134_s2 = scalar_lea.vmem [#allocation5], %s322_s28 }
  0x3b   : > { %s241_s3 = sshll.u32 %s134_s2, 4  ;;  %s633_s5 = scalar_lea.hbm %s684_s1, %s331_s29  ;;  %s635_s3 = int_to_ptr.vmem [resolvable:$true] %s241_s3 }
  0x3c   : > { %vm140_vm1 = vcmp.eq.s32.totalorder %v136_v11, 0  ;;  %vm141_vm2 = vcmp.eq.s32.totalorder %v136_v11, 15  ;;  %v139_v23 = vadd.s32 8, %v138_v13  ;;  %vm142_vm3 = vcmp.eq.s32.totalorder %v138_v13, 0  ;;  %s228_s11 = scalar_lea.sflag [#allocation4], %s606_s23  ;;  %s415_s13 = scalar_lea.vmem %s635_s3, 512 }
  0x3d   : > { %152 = vrot.lane.b32.xlu0 %v147_v1, %s486_s25  ;;  %vm189_vm4 = vcmp.lt.s32.totalorder %v138_v13, 1  ;;  %vm196_vm6 = vcmp.lt.s32.totalorder %v138_v13, 7  ;;  %p416_p6 = scmp.ne.s32.totalorder %s635_s3, %s415_s13  ;;  %p691_p11 = scmp.ne.s32.totalorder %s688_s18, 0 }
  0x3e   : > { %vm145_vm5 = vcmp.eq.s32.totalorder %v139_v23, 15  ;;  %s489_s14 = smov [#allocation5]  }
  0x3f   : > { %p417_p12 = pnand %p416_p6, %p691_p11  ;;  %s419_s16 = sshll.u32 %s489_s14, 4  ;;  %s420_s16 = int_to_ptr.vmem [resolvable:$false] %s419_s16 }
  0x40   : > { %s421_s20 = scalar_lea.vmem %s420_s16, 1024  ;;  %p422_p8 = scmp.lt.s32.totalorder %s635_s3, %s420_s16 }
  0x41   : > { %p418_p13 = pneg %p417_p12  ;;  %p423_p10 = scmp.lt.s32.totalorder %s421_s20, %s415_s13 }
  0x43   : > { %p424_p0 = por %p423_p10, %p422_p8 }
  0x45   : > { %p425_p2 = pnand %p424_p0, %p418_p13 }
  0xab   : > { %v150_v2 = vpop.permute.xlu0 %149 }
  0xac   : > { %v151_v3 = vsel %vm148_vm0, %v150_v2, %v146_v0 }
  0xad   : > { %155 = vrot.lane.b32.xlu1 %v151_v3, %s486_s25 }
  0xaf   : > { %v153_v4 = vpop.permute.xlu0 %152 }
  0xb0   : > { %v154_v5 = vsel %vm148_vm0, %v153_v4, %v147_v1 }
  0xb1   : > { %157 = vrot.lane.b32.xlu1 %v154_v5, %s486_s25 }
 0x11f   : > { %v156_v6 = vpop.permute.xlu1 %155 }
 0x120   : > { %v159_v7 = vsel %vm148_vm0, %v156_v6, %v146_v0 }
 0x121   : > { %163 = vrot.lane.b32.xlu0 %v159_v7, %s487_s27 }
 0x123   : > { %v158_v8 = vpop.permute.xlu1 %157 }
 0x124   : > { %v160_v9 = vsel %vm148_vm0, %v158_v8, %v147_v1 }
 0x125   : > { %171 = vrot.lane.b32.xlu0 %v159_v7, %s488_s17  ;;  %165 = vrot.lane.b32.xlu1 %v160_v9, %s487_s27 }
 0x129   : > { %173 = vrot.lane.b32.xlu1 %v160_v9, %s488_s17 }
 0x193   : > { %v164_v12 = vpop.permute.xlu0 %163 }
 0x194   : > { %v169_v15 = vsel %vm140_vm1, 0.0, %v164_v12 }
 0x195   : > { %v183_v21 = vadd.f32 %v181_v14, %v169_v15 }
 0x197   : > { %v166_v17 = vpop.permute.xlu1 %165  ;;  %v172_v18 = vpop.permute.xlu0 %171 }
 0x198   : > { %v170_v19 = vsel %vm140_vm1, 0.0, %v166_v17  ;;  %v177_v20 = vsel %vm141_vm2, 0.0, %v172_v18 }
 0x199   : > { %v179_v22 = vsub.f32 %v169_v15, %v177_v20  ;;  %v184_v24 = vadd.f32 %v182_v16, %v170_v19  ;;  %v185_v26 = vadd.f32 %v183_v21, %v177_v20 }
 0x19b   : > { %v174_v25 = vpop.permute.xlu1 %173  ;;  %v187_v30 = vrot.slane %v179_v22, 7  ;;  %v194_v31 = vrot.slane %v179_v22, 1  ;;  %v201_v36 = vrot.slane %v185_v26, 7  ;;  %v207_v37 = vrot.slane %v185_v26, 1 }
 0x19c   : > { %v178_v27 = vsel %vm141_vm2, 0.0, %v174_v25  ;;  %v213_v39 = vmul.f32 2.0, %v179_v22 }
 0x19d   : > { %v180_v28 = vsub.f32 %v170_v19, %v178_v27  ;;  %v186_v29 = vadd.f32 %v184_v24, %v178_v27 }
 0x19f   : > { %v188_v32 = vrot.slane %v180_v28, 7  ;;  %v195_v33 = vrot.slane %v180_v28, 1  ;;  %v202_v34 = vrot.slane %v186_v29, 7  ;;  %v208_v35 = vrot.slane %v186_v29, 1 }
 0x1a0   : > { %v214_v38 = vmul.f32 2.0, %v180_v28 }
 0x1a1   : > { %v190_v40 = vsel %vm189_vm4, %v187_v30, %v188_v32  ;;  %v191_v41 = vsel %vm189_vm4, %v188_v32, %v187_v30  ;;  %v198_v42 = vsel %vm196_vm6, %v195_v33, %v194_v31  ;;  %v203_v45 = vsel %vm189_vm4, %v201_v36, %v202_v34 }
 0x1a2   : > { %v192_v43 = vsel %vm142_vm3, 0.0, %v191_v41  ;;  %v200_v44 = vsel %vm145_vm5, 0.0, %v198_v42  ;;  %v204_v46 = vsel %vm189_vm4, %v202_v34, %v201_v36  ;;  %v209_v48 = vsel %vm196_vm6, %v207_v37, %v208_v35 }
 0x1a3   : > { %v205_v47 = vsel %vm142_vm3, 0.0, %v204_v46  ;;  %v210_v49 = vsel %vm196_vm6, %v208_v35, %v207_v37  ;;  %v215_v50 = vadd.f32 %v213_v39, %v192_v43  ;;  %v197_v51 = vsel %vm196_vm6, %v194_v31, %v195_v33 }
 0x1a4   : > { %v212_v52 = vsel %vm145_vm5, 0.0, %v210_v49  ;;  %v216_v53 = vadd.f32 %v214_v38, %v190_v40  ;;  %v219_v54 = vsub.f32 %v205_v47, %v209_v48 }
 0x1a5   : > { %v217_v55 = vadd.f32 %v215_v50, %v197_v51  ;;  %v220_v56 = vsub.f32 %v203_v45, %v212_v52 }
 0x1a6   : > { %v218_v57 = vadd.f32 %v216_v53, %v200_v44  ;;  %323 = vst.msk [vmem:[%s134_s2 + $0x10] sm:$0xff] %vm221_vm7, %v219_v54 }
 0x1a7   : > { %222 = vst.msk [vmem:[%s134_s2] sm:$0xff] %vm221_vm7, %v217_v55  ;;  %324 = vst.msk [vmem:[%s134_s2 + $0x18] sm:$0xff] %vm221_vm7, %v220_v56 }
 0x1a8   : > { %223 = vst.msk [vmem:[%s134_s2 + $0x8] sm:$0xff] %vm221_vm7, %v218_v57 }
 0x1a9   : > { %428 = shalt.err (!%p425_p2)
}
 0x1aa   : > { %s429_s21 = scalar_lea.hbm %s633_s5, 512  ;;  %s433_s26 = scalar_lea.hbm %s684_s1, 1024 }
 0x1ab   : > { %p430_p4 = scmp.ne.s32.totalorder %s633_s5, %s429_s21  ;;  %p434_p9 = scmp.lt.u32.totalorder %s633_s5, %s684_s1 }
 0x1ac   : > { %p435_p1 = scmp.lt.u32.totalorder %s433_s26, %s429_s21  ;;  %p437_p6 = scmp.lt.u32.totalorder %s429_s21, %s633_s5 }
 0x1ad   : > { %p431_p5 = pnand %p430_p4, %p691_p11 }
 0x1ae   : > { %p436_p3 = por %p435_p1, %p434_p9 }
 0x1af   : > { %p432_p7 = pneg %p431_p5 }
 0x1b0   : > { %p438_p12 = por %p437_p6, %p436_p3 }
 0x1b2   : > { %p439_p13 = pnand %p438_p12, %p432_p7 }
 0x1b4   : > { %442 = shalt.err (!%p439_p13)
}
 0x1b5   : > { %s490_s27 = smov 128   ;;  %s491_s17 = smov 8  }
 0x1b6   : > { %334 = dma.vmem_to_hbm [thread:$0]  (%p691_p11), %s635_s3, 512, %s633_s5, %s228_s11, %s490_s27, %s490_s27, %s491_s17  }
 0x1b7 PF: > { %s256_s28 = sand.u32 1, %s469_s6   ;;  %p692_p8 = scmp.ne.s32.totalorder %s689_s19, 0 }
 0x1b8   : > { %p693_p10 = scmp.ge.s32.totalorder %s481_s9, 2  ;;  %s257_s29 = scalar_lea.sflag [#allocation4], %s256_s28 }
 0x1ba   : > { %p341_p0 = pnand %p693_p10, %p692_p8 }
 0x1bc   : > { %464 = dma.done.wait (!%p341_p0), %s257_s29, 512  }
 0x1bd   : > { %466 = vsyncadd (!%p341_p0), %s257_s29, 4294966784  ;;  %p14_p2 = scmp.ge.s32.totalorder %s527_s12, 4   ;;  %s694_s6 = smov %s473_s7 }
 0x1be   : > { %s695_s7 = smov %s477_s8  ;;  %s696_s8 = smov %s539_s15 }
 0x1bf   : > { %s697_s9 = smov %s527_s12  ;;  %16 = sbr.rel (!%p14_p2) target bundleno = 5 (0x5), region = 70 }
 0x1c6   :  { %262 = vsyncpa [#allocation3], 1 }
 0x1c7   :  { %264 = vsyncpa [#allocation3 + $0x1], 1 }
 0x1c8   :  { %265 = vsyncpa [#allocation4], 1 }
 0x1c9   :  { %267 = vsyncpa [#allocation4 + $0x1], 1 }

</bundles_post_ra>
